<compile_context>
chip_gen: v5e
topology: v5e:2x2
jax: 0.10.0
libtpu: 0.0.40
codegen_flags: <defaults>
</compile_context>

<pallas_src>
import math

import jax
import jax.numpy as jnp
from jax.experimental import pallas as pl
from jax.experimental.pallas import tpu as pltpu

NEGATIVE_SLOPE = 0.1

# Below this total byte size a grid is pure overhead: one whole-array block.
_SMALL_BYTES = 256 << 10


def _round_up(x, m):
    return (x + m - 1) // m * m


def _round_down(x, m):
    return (x // m) * m


def _device_kind():
    try:
        return jax.devices()[0].device_kind.lower()
    except Exception:
        return ""


def _target_tile_bytes(kind):
    # VMEM cost is ~6x the tile (3 arrays x 2 pipeline buffers).
    if "v7" in kind or "v6" in kind:
        return 4 << 20  # 24 MiB total: fits the 32 MiB default scoped VMEM.
    return 2 << 20      # 12 MiB total: fits v5e's 16 MiB default (safe everywhere).


def _lane_dense_view(total):
    """Pick (rows, lanes) with lanes a large multiple of 128 dividing `total`
    and rows >= 8 (no sublane padding). Returns None if impossible."""
    lanes = 32768
    while lanes >= 128:
        if total % lanes == 0 and total // lanes >= 8:
            return total // lanes, lanes
        lanes //= 2
    return None


def _leaky_relu_bwd_kernel(grad_ref, input_ref, out_ref):
    g = grad_ref[...]
    x = input_ref[...]
    # grad where x > 0, grad * negative_slope otherwise.
    out_ref[...] = jnp.where(x > 0, g, g * NEGATIVE_SLOPE)


def leaky_relu_backward(grad: jax.Array, inp: jax.Array) -> jax.Array:
    assert grad.shape == inp.shape, "grad/input shape mismatch"
    assert grad.dtype == inp.dtype == jnp.float32, "expected float32 inputs"

    orig_shape = grad.shape
    total = math.prod(orig_shape) if orig_shape else 1
    if total == 0:
        # Size-0 tensor: nothing to compute.
        return grad

    itemsize = 4
    nbytes = total * itemsize
    kind = _device_kind()
    tile_bytes = _target_tile_bytes(kind)
    tile_elems = max(1024, tile_bytes // itemsize)

    cost = pl.CostEstimate(
        flops=2 * total, transcendentals=0, bytes_accessed=3 * nbytes
    )

    # --- pick a 2-D view: lane-dense flatten when total allows --------------
    view = _lane_dense_view(total)
    if view is not None:
        M, N = view
    elif grad.ndim <= 1:
        M, N = 1, total
    else:
        M, N = total // orig_shape[-1], orig_shape[-1]
    g2 = grad.reshape(M, N)
    x2 = inp.reshape(M, N)
    out_shape = jax.ShapeDtypeStruct((M, N), jnp.float32)

    # --- tiny-input path: single whole-array block, no grid -----------------
    if nbytes <= _SMALL_BYTES:
        out2 = pl.pallas_call(
            _leaky_relu_bwd_kernel, out_shape=out_shape, cost_estimate=cost
        )(g2, x2)
        return out2.reshape(orig_shape)

    # --- large-input path: big lane-dense blocks, pipelined grid ------------
    if view is not None:
        # Lane-dense layout: full-width (tm, N) row blocks, 1-D grid.
        tm = max(8, _round_down(tile_elems // N, 8))
        if "v7" in kind and M >= 16:
            # Give both v7x TensorCores work: at least 2 grid steps.
            tm = min(tm, _round_up(pl.cdiv(M, 2), 8))
        if tm >= M:
            tm = M
        grid = (pl.cdiv(M, tm),)
        spec = pl.BlockSpec((tm, N), lambda i: (i, 0))
        dims = ("parallel",)
    else:
        # Ragged fallback (total not a multiple of 128): bound tile footprint
        # against the padded (8,128) layout so VMEM never blows up.
        n_pad = _round_up(N, 128)
        if 8 * n_pad * itemsize <= tile_bytes:
            # Row-spanning (tm, N) blocks.
            tm = max(8, _round_down(tile_bytes // (n_pad * itemsize), 8))
            if "v7" in kind and M >= 16:
                tm = min(tm, _round_up(pl.cdiv(M, 2), 8))
            if tm >= M:
                tm = M
            grid = (pl.cdiv(M, tm),)
            spec = pl.BlockSpec((tm, N), lambda i: (i, 0))
            dims = ("parallel",)
        else:
            # N itself is huge: also tile the lane axis (multiples of 128).
            tm = min(M, 8)
            tn = max(128, _round_down(tile_bytes // (8 * itemsize), 128))
            if tn >= N:
                tn = N
            grid = (pl.cdiv(M, tm), pl.cdiv(N, tn))
            spec = pl.BlockSpec((tm, tn), lambda i, j: (i, j))
            dims = ("parallel", "parallel")

    out2 = pl.pallas_call(
        _leaky_relu_bwd_kernel,
        out_shape=out_shape,
        grid_spec=pl.GridSpec(grid=grid, in_specs=[spec, spec], out_specs=spec),
        compiler_params=pltpu.CompilerParams(dimension_semantics=dims),
        cost_estimate=cost,
    )(g2, x2)
    return out2.reshape(orig_shape)


def leaky_relu_backward_ref(grad, inp):
    return jnp.where(inp > 0, grad, grad * NEGATIVE_SLOPE)


if __name__ == "__main__":
    key = jax.random.PRNGKey(0)
    kg, ki, kg2, ki2, kg3, ki3 = jax.random.split(key, 6)

    # Static shape from the module spec: [3, 4, 5] float32 (tiny path).
    grad = jax.random.normal(kg, (3, 4, 5), dtype=jnp.float32)
    inp = jax.random.normal(ki, (3, 4, 5), dtype=jnp.float32)
    out = leaky_relu_backward(grad, inp)
    jax.block_until_ready(out)
    assert out.shape == grad.shape
    assert jnp.allclose(out, leaky_relu_backward_ref(grad, inp),
                        atol=1e-6, rtol=1e-6), "mismatch (small path)"

    # Lane-dense flattened grid path (total divisible by 128, small last dim).
    grad_l = jax.random.normal(kg2, (1024, 640), dtype=jnp.float32)
    inp_l = jax.random.normal(ki2, (1024, 640), dtype=jnp.float32)
    out_l = leaky_relu_backward(grad_l, inp_l)
    jax.block_until_ready(out_l)
    assert jnp.allclose(out_l, leaky_relu_backward_ref(grad_l, inp_l),
                        atol=1e-6, rtol=1e-6), "mismatch (lane-dense grid path)"

    # Ragged fallback path (total not a multiple of 128).
    grad_r = jax.random.normal(kg3, (513, 257), dtype=jnp.float32)
    inp_r = jax.random.normal(ki3, (513, 257), dtype=jnp.float32)
    out_r = leaky_relu_backward(grad_r, inp_r)
    jax.block_until_ready(out_r)
    assert jnp.allclose(out_r, leaky_relu_backward_ref(grad_r, inp_r),
                        atol=1e-6, rtol=1e-6), "mismatch (ragged fallback path)"

    print("KERNEL_OK")
</pallas_src>

<mosaic_0001>
module attributes {stable_mosaic.version = 11 : i64} {
  func.func @_leaky_relu_bwd_kernel(%arg0: memref<12x5xf32, #tpu.memory_space<vmem>>, %arg1: memref<12x5xf32, #tpu.memory_space<vmem>>, %arg2: memref<12x5xf32, #tpu.memory_space<vmem>>) attributes {dimension_semantics = [], scalar_prefetch = 0 : i64, scratch_operands = 0 : i64, tpu.core_type = #tpu.core_type<tc>} {
    %c0 = arith.constant 0 : index
    %c0_0 = arith.constant 0 : index
    %0 = vector.load %arg0[%c0, %c0_0] : memref<12x5xf32, #tpu.memory_space<vmem>>, vector<12x5xf32>
    %c0_1 = arith.constant 0 : index
    %c0_2 = arith.constant 0 : index
    %1 = vector.load %arg1[%c0_1, %c0_2] : memref<12x5xf32, #tpu.memory_space<vmem>>, vector<12x5xf32>
    %cst = arith.constant 0.000000e+00 : f32
    %2 = vector.broadcast %cst : f32 to vector<12x5xf32>
    %3 = arith.cmpf ogt, %1, %2 : vector<12x5xf32>
    %cst_3 = arith.constant 1.000000e-01 : f32
    %4 = vector.broadcast %cst_3 : f32 to vector<12x5xf32>
    %5 = arith.mulf %0, %4 : vector<12x5xf32>
    %6 = arith.select %3, %0, %5 : vector<12x5xi1>, vector<12x5xf32>
    %c0_4 = arith.constant 0 : index
    %c0_5 = arith.constant 0 : index
    %7 = vector.load %arg2[%c0_4, %c0_5] : memref<12x5xf32, #tpu.memory_space<vmem>>, vector<12x5xf32>
    tpu.vector_store %arg2[%c0_4, %c0_5], %6 {strides = array<i32>} : memref<12x5xf32, #tpu.memory_space<vmem>>, vector<12x5xf32>,
    return
  }
}

</mosaic_0001>

<bundles_post_ra>
// kernel: tpu_custom_call.1
= control target key start
LH: loop header
LB: loop body
LE: loop exit
PB: predicated region body
PF: predicated region fallthrough
CT: control target
= control target key end

     0   :  { %vm21_vm1 = vcmask 39936   ;;  %vm23_vm3 = vcmask 35840   ;;  %s62_s0 = inlined_call_operand.vmem [shape: f32[12,5], index: 0, kind: input, shape index: {}]   ;;  %s63_s1 = inlined_call_operand.vmem [shape: f32[12,5], index: 1, kind: input, shape index: {}]   ;;  %s64_s2 = inlined_call_operand.vmem [shape: f32[12,5], index: 2, kind: output, shape index: {}]  }
   0x1   :  { %v11_v0 = vld [vmem:[%s62_s0] sm:$0xff]  ;;  %v12_v2 = vld [vmem:[%s62_s0 + $0x8] sm:$0xf] }
   0x2   :  { %v13_v1 = vld [vmem:[%s63_s1] sm:$0xff]  ;;  %v17_v3 = vmul.f32 0.1, %v11_v0  ;;  %v14_v4 = vld [vmem:[%s63_s1 + $0x8] sm:$0xf] }
   0x3   :  { %vm15_vm0 = vcmp.gt.f32.partialorder %v13_v1, 0.0  ;;  %vm16_vm2 = vcmp.gt.f32.partialorder %v14_v4, 0.0  ;;  %v18_v5 = vmul.f32 0.1, %v12_v2 }
   0x4   :  { %v19_v6 = vsel %vm15_vm0, %v11_v0, %v17_v3 }
   0x5   :  { %22 = vst.msk [vmem:[%s64_s2] sm:$0xff] %vm21_vm1, %v19_v6  ;;  %v20_v7 = vsel %vm16_vm2, %v12_v2, %v18_v5 }
   0x6   :  { %24 = vst.msk [vmem:[%s64_s2 + $0x8] sm:$0xf] %vm23_vm3, %v20_v7 }

</bundles_post_ra>
